<compile_context>
chip_gen: v6e
topology: v6e:2x2x1
jax: 0.10.0
libtpu: 0.0.40
codegen_flags: <defaults>
</compile_context>

<pallas_src>
import functools

import numpy as np

import jax
import jax.numpy as jnp
from jax.experimental import pallas as pl
from jax.experimental.pallas import tpu as pltpu


def _round_up(x, m):
    return ((x + m - 1) // m) * m


def _lifter_kernel(x_ref, m_ref, y_ref):
    # One fused MXU matmul: (TB, K) @ (K, 2N) -> (TB, 2N) packed [yr | yi].
    y_ref[...] = jnp.dot(x_ref[...], m_ref[...],
                         preferred_element_type=jnp.float32)


@functools.lru_cache(maxsize=None)
def _build_lifter_matrix(n, lifter_size, complex_input):
    """Packed real matrix M so that  [yr | yi] = X_packed @ M.

    A = F diag(keep) F^{-1}  (y = A x as a column vector), m = A.T so rows
    right-multiply.  Built with numpy once per (n, lifter_size) and cached.
    """
    idx = np.arange(n)
    if n - 2 * lifter_size > 0:
        keep = (idx < lifter_size) | (idx >= n - lifter_size)
    else:
        # torch slice cep[..., L:-L] is empty -> nothing zeroed
        keep = np.ones((n,), dtype=bool)
    w = keep.astype(np.complex64)
    finv = np.fft.ifft(np.eye(n, dtype=np.complex64), axis=0)   # F^{-1}
    a = np.fft.fft(w[:, None] * finv, axis=0)                   # F diag(w) F^{-1}
    m = a.T                                                     # right-multiply form
    mr = np.ascontiguousarray(m.real).astype(np.float32)
    mi = np.ascontiguousarray(m.imag).astype(np.float32)
    if complex_input:
        # (xr + i xi)(mr + i mi) = [xr|xi] @ [[mr, mi], [-mi, mr]]
        packed = np.block([[mr, mi], [-mi, mr]])                # (2n, 2n)
    else:
        packed = np.concatenate([mr, mi], axis=1)               # (n, 2n)
    return packed.astype(np.float32)
    # TODO(synk): for 2*lifter_size << N a low-rank factored form
    # (x @ Finv[:, keep]) @ F[keep, :] cuts FLOPs ~N/(2L)x once MXU-bound.


def cepstrum_liftering(x, lifter_size):
    if lifter_size <= 0:
        raise ValueError('lifter_size must be > 0.')
    n = x.shape[-1]
    complex_input = bool(jnp.iscomplexobj(x))

    m = jnp.asarray(_build_lifter_matrix(n, lifter_size, complex_input))

    if complex_input:
        xc = x.astype(jnp.complex64)
        xp = jnp.concatenate(
            [jnp.real(xc), jnp.imag(xc)], axis=-1).astype(jnp.float32)
    else:
        # real fast path: the imaginary input plane is never materialized.
        xp = x.astype(jnp.float32)
    k = xp.shape[-1]                       # n (real input) or 2n (complex)

    xp = xp.reshape(-1, k)
    b = xp.shape[0]

    # Pad rows to a sublane multiple and tile the batch so X/Y tiles stream
    # (double-buffered) while the matrix stays resident across grid steps.
    b_pad = _round_up(b, 8)
    if b_pad != b:
        xp = jnp.pad(xp, ((0, b_pad - b), (0, 0)))
    tb = min(512, b_pad)                   # keeps VMEM well within limits
    grid = (pl.cdiv(b_pad, tb),)

    y2 = pl.pallas_call(
        _lifter_kernel,
        out_shape=jax.ShapeDtypeStruct((b_pad, 2 * n), jnp.float32),
        grid=grid,
        in_specs=[
            pl.BlockSpec((tb, k), lambda i: (i, 0)),        # X tiles stream
            pl.BlockSpec((k, 2 * n), lambda i: (0, 0)),     # M resident
        ],
        out_specs=pl.BlockSpec((tb, 2 * n), lambda i: (i, 0)),
        compiler_params=pltpu.CompilerParams(
            dimension_semantics=("parallel",)),             # megacore on v7x
    )(xp, m)

    yr = y2[:b, :n]
    yi = y2[:b, n:]
    y = (yr + 1j * yi).astype(jnp.complex64).reshape(x.shape)
    return y


if __name__ == "__main__":
    key = jax.random.PRNGKey(0)
    B, C, N = 2, 4, 32           # small shapes; FFT axis is last
    LIFTER_SIZE = 4
    x = jax.random.normal(key, (B, C, N), dtype=jnp.float32)

    y = cepstrum_liftering(x, LIFTER_SIZE)
    y = jax.block_until_ready(y)

    # reference (plain jnp fft, same semantics as the torch module)
    cep = jnp.fft.ifft(x.astype(jnp.complex64), axis=-1)
    idx = jnp.arange(N)
    keep = (idx < LIFTER_SIZE) | (idx >= N - LIFTER_SIZE)
    y_ref = jnp.fft.fft(cep * keep, axis=-1)

    assert y.shape == x.shape and y.dtype == jnp.complex64
    assert jnp.max(jnp.abs(y - y_ref)) < 1e-3

    print("KERNEL_OK")
</pallas_src>

<mosaic_0001>
module attributes {stable_mosaic.version = 11 : i64} {
  func.func @_lifter_kernel(%arg0: i32, %arg1: memref<8x32xf32, #tpu.memory_space<vmem>>, %arg2: memref<32x64xf32, #tpu.memory_space<vmem>>, %arg3: memref<8x64xf32, #tpu.memory_space<vmem>>) attributes {dimension_semantics = [#tpu.dimension_semantics<parallel>], iteration_bounds = array<i64: 1>, scalar_prefetch = 0 : i64, scratch_operands = 0 : i64, tpu.core_type = #tpu.core_type<tc>, window_params = [{transform_indices = @transform_0, window_bounds = array<i64: 8, 32>}, {pipeline_mode = #tpu.pipeline_mode<synchronous>, transform_indices = @transform_1, window_bounds = array<i64: 32, 64>}, {transform_indices = @transform_2, window_bounds = array<i64: 8, 64>}]} {
    %c0 = arith.constant 0 : index
    %c0_0 = arith.constant 0 : index
    %0 = vector.load %arg1[%c0, %c0_0] : memref<8x32xf32, #tpu.memory_space<vmem>>, vector<8x32xf32>
    %c0_1 = arith.constant 0 : index
    %c0_2 = arith.constant 0 : index
    %1 = vector.load %arg2[%c0_1, %c0_2] : memref<32x64xf32, #tpu.memory_space<vmem>>, vector<32x64xf32>
    %cst = arith.constant dense<0.000000e+00> : vector<8x64xf32>
    %2 = tpu.matmul %0, %1, %cst {dimension_numbers = #tpu.dot_dimension_numbers<[1], [0], [0], [1], [0, 0, 1, 1], [], []>} : vector<8x32xf32>, vector<32x64xf32>, vector<8x64xf32> -> vector<8x64xf32>
    %c0_3 = arith.constant 0 : index
    %c0_4 = arith.constant 0 : index
    %3 = vector.load %arg3[%c0_3, %c0_4] : memref<8x64xf32, #tpu.memory_space<vmem>>, vector<8x64xf32>
    tpu.vector_store %arg3[%c0_3, %c0_4], %2 {strides = array<i32>} : memref<8x64xf32, #tpu.memory_space<vmem>>, vector<8x64xf32>,
    return
  }
  func.func @transform_0(%arg0: i32) -> (i32, i32) {
    %c0_i32 = arith.constant 0 : i32
    %c0_i32_0 = arith.constant 0 : i32
    return %arg0, %c0_i32 : i32, i32
  }
  func.func @transform_1(%arg0: i32) -> (i32, i32) {
    %c0_i32 = arith.constant 0 : i32
    %c0_i32_0 = arith.constant 0 : i32
    %c0_i32_1 = arith.constant 0 : i32
    return %c0_i32, %c0_i32_0 : i32, i32
  }
  func.func @transform_2(%arg0: i32) -> (i32, i32) {
    %c0_i32 = arith.constant 0 : i32
    %c0_i32_0 = arith.constant 0 : i32
    return %arg0, %c0_i32 : i32, i32
  }
}

</mosaic_0001>

<bundles_post_ra>
// kernel: tpu_custom_call.1
= control target key start
LH: loop header
LB: loop body
LE: loop exit
PB: predicated region body
PF: predicated region fallthrough
CT: control target
= control target key end

     0   :  { %7 = vsyncpa [#allocation3], 0  ;;  %s256_s0 = inlined_call_operand.hbm [shape: f32[8,32], index: 0, kind: input, shape index: {}]   ;;  %s257_s1 = inlined_call_operand.hbm [shape: f32[32,64], index: 1, kind: input, shape index: {}]   ;;  %s258_s2 = inlined_call_operand.hbm [shape: f32[8,64], index: 2, kind: output, shape index: {}]  }
   0x1   :  { %8 = vsyncpa [#allocation6], 0 }
   0x2   :  { %9 = vsyncpa [#allocation4], 0  ;;  %s225_s9 = smov [#allocation2]   ;;  %s226_s11 = smov [#allocation5]  }
   0x3   :  { %s16_s10 = sshll.u32 %s225_s9, 4  ;;  %s25_s12 = sshll.u32 %s226_s11, 4  ;;  %s17_s10 = int_to_ptr.vmem [resolvable:$true] %s16_s10  ;;  %s26_s12 = int_to_ptr.vmem [resolvable:$true] %s25_s12 }
   0x4   :  { %s167_s13 = scalar_lea.vmem %s17_s10, 128  ;;  %p172_p1 = scmp.lt.s32.totalorder %s17_s10, %s17_s10 }
   0x5   :  { %p168_p0 = scmp.ne.s32.totalorder %s17_s10, %s167_s13  ;;  %p173_p2 = scmp.lt.s32.totalorder %s167_s13, %s167_s13 }
   0x7   :  { %p174_p3 = por %p173_p2, %p172_p1 }
   0x9   :  { %p175_p4 = pnand %p174_p3, %p168_p0 }
   0xb   :  { %178 = shalt.err (!%p175_p4)
}
   0xc   :  { %19 = dma.hbm_to_vmem [thread:$0]  %s256_s0, 128, %s17_s10, [#allocation3]  }
   0xd   :  { %s187_s16 = scalar_lea.vmem %s26_s12, 512  ;;  %p192_p6 = scmp.lt.s32.totalorder %s26_s12, %s26_s12 }
   0xe   :  { %p188_p5 = scmp.ne.s32.totalorder %s26_s12, %s187_s16  ;;  %p193_p7 = scmp.lt.s32.totalorder %s187_s16, %s187_s16 }
  0x10   :  { %p194_p8 = por %p193_p7, %p192_p6 }
  0x12   :  { %p195_p9 = pnand %p194_p8, %p188_p5 }
  0x14   :  { %198 = shalt.err (!%p195_p9)
}
  0x15   :  { %s227_s17 = smov 128   ;;  %s228_s18 = smov 8  }
  0x16   :  { %31 = dma.hbm_to_vmem [thread:$0]  %s257_s1, 512, %s26_s12, [#allocation6], %s227_s17, %s227_s17, %s228_s18  }
  0x17   :  { %219 = dma.done.wait [#allocation3], 128  }
  0x18   :  { %220 = vsyncadd [#allocation3], 4294967168 }
  0x19   :  { %221 = dma.done.wait [#allocation6], 512  }
  0x1a   :  { %222 = vsyncadd [#allocation6], 4294966784  ;;  %v229_v0 = vmov 0.0   ;;  %vm230_vm0 = vmmov 0   ;;  %v42_v1 = vld [vmem:[#allocation5 + $0x18] sm:$0xff]  ;;  %v41_v2 = vld [vmem:[#allocation5 + $0x10] sm:$0xff] }
  0x1b   :  { %141 = vmatprep.subr.mxu0 %v229_v0  ;;  %149 = vmatprep.mubr.msk.f32.mxu0 %vm230_vm0, %v229_v0  ;;  %v40_v3 = vld [vmem:[#allocation5 + $0x8] sm:$0xff]  ;;  %v39_v4 = vld [vmem:[#allocation5] sm:$0xff]  ;;  %v38_v5 = vld [vmem:[#allocation2] sm:$0xff]  ;;  %vm43_vm1 = vcmask 261120   ;;  %s231_s0 = smov [#allocation7]   ;;  %vm117_vm2 = vcmask 523264  }
  0x1c   :  { %142 = vmatpush3.msra.mxu0 %v42_v1  ;;  %s125_s1 = sshll.u32 %s231_s0, 4  ;;  %s126_s1 = int_to_ptr.vmem [resolvable:$true] %s125_s1 }
  0x1d   :  { %143 = vmatprep.subr.mxu0 %v229_v0  ;;  %s199_s21 = scalar_lea.vmem %s126_s1, 128  ;;  %p204_p11 = scmp.lt.s32.totalorder %s126_s1, %s126_s1 }
  0x1e   :  { %144 = vmatpush3.msra.mxu0 %v41_v2  ;;  %p200_p10 = scmp.ne.s32.totalorder %s126_s1, %s199_s21  ;;  %p205_p12 = scmp.lt.s32.totalorder %s199_s21, %s199_s21 }
  0x1f   :  { %145 = vmatprep.subr.mxu0 %v229_v0 }
  0x20   :  { %146 = vmatpush3.msra.mxu0 %v40_v3  ;;  %p206_p13 = por %p205_p12, %p204_p11 }
  0x21   :  { %147 = vmatprep.subr.mxu0 %v229_v0 }
  0x22   :  { %148 = vmatpush3.msra.mxu0 %v39_v4  ;;  %p207_p0 = pnand %p206_p13, %p200_p10 }
  0x23   :  { %150 = vmatmul.mubr.msk.f32.vlgmr.msra.gmra.mxu0 %vm43_vm1, %v38_v5 }
  0xe3   :  { %v113_v6 = vpop.f32.mrf.mxu0 }
  0xe4   :  { %118 = vst.msk [vmem:[#allocation7] sm:$0xff] %vm117_vm2, %v113_v6 }
  0xe5   :  { %v151_v7 = vpop.f32.mrf.mxu0 }
  0xe6   :  { %210 = shalt.err (!%p207_p0)
}
  0xe7   :  { %128 = dma.vmem_to_hbm [thread:$0]  %s126_s1, 128, %s258_s2, [#allocation4]  }
  0xe8   :  { %223 = dma.done.wait [#allocation4], 128  }
  0xe9   :  { %224 = vsyncadd [#allocation4], 4294967168 }
  0xea   :  { %132 = vsyncpa [#allocation3], 1 }
  0xeb   :  { %133 = vsyncpa [#allocation6], 1 }
  0xec   :  { %134 = vsyncpa [#allocation4], 1 }

</bundles_post_ra>
